<compile_context>
chip_gen: v6e
topology: v6e:2x2x1
jax: 0.10.0
libtpu: 0.0.40
codegen_flags: <defaults>
</compile_context>

<pallas_src>
import jax
import jax.numpy as jnp
from jax.experimental import pallas as pl
from jax.experimental.pallas import tpu as pltpu


def _round_up(a, m):
    return ((a + m - 1) // m) * m


def _sublane_tile(dtype):
    """Second-minor tile size for this dtype (f32: 8, bf16: 16, int8/fp8: 32)."""
    itemsize = jnp.dtype(dtype).itemsize
    return max(8, 32 // max(1, itemsize))


def _vmem_capacity_bytes():
    try:
        return int(pltpu.get_tpu_info().vmem_capacity_bytes)
    except Exception:
        return 64 << 20  # conservative (v7x-sized) fallback


def _trim_kernel(x_ref, o_ref):
    # Static slices: they are no-ops whenever the trim was already expressed
    # in the input BlockSpec (H_out sublane-aligned and/or W_out % 128 == 0),
    # in which case this lowers to a plain unmasked VMEM copy.
    o_ref[...] = x_ref[:, : o_ref.shape[1], : o_ref.shape[2]]


def tensor_trimmer_pallas(x, *, target_block_bytes=None):
    """Pallas equivalent of PyTorch: input_tensor[:, :, :-1, :-1] (NCHW)."""
    n, c, h, w = x.shape
    h_out, w_out = h - 1, w - 1
    nc = n * c

    # Degenerate / empty outputs: no kernel needed.
    if nc == 0 or h_out <= 0 or w_out <= 0:
        return x[:, :, :h_out, :w_out]

    itemsize = jnp.dtype(x.dtype).itemsize
    sub = _sublane_tile(x.dtype)

    vmem_cap = _vmem_capacity_bytes()
    if target_block_bytes is None:
        # Bigger blocks on 128 MiB parts (v5e/v6e), smaller on 64 MiB (v7x).
        target_block_bytes = (16 << 20) if vmem_cap > (96 << 20) else (8 << 20)
    target_block_bytes = max(256 << 10, int(target_block_bytes))

    # Free view: fuse N and C.
    x3 = x.reshape(nc, h, w)

    # Express the trims directly in the input BlockSpec whenever the trimmed
    # extent is tile-aligned for this dtype; the dropped row/column is then
    # never DMA'd from HBM.
    h_in_dim = h_out if (h_out % sub == 0) else h
    w_in_dim = w_out if (w_out % 128 == 0) else w

    # Padded VMEM footprint per fused channel (lane dim pads to 128, sublane
    # dim to the dtype tile) -> drives block sizing and the VMEM limit.
    in_c_vmem = _round_up(h_in_dim, sub) * _round_up(w_in_dim, 128) * itemsize
    out_c_vmem = _round_up(h_out, sub) * _round_up(w_out, 128) * itemsize
    per_c_vmem = in_c_vmem + out_c_vmem

    # --- Block / grid selection -------------------------------------------
    tile_h = False
    h_blk = h_out
    if per_c_vmem > target_block_bytes:
        # One fused channel is already bigger than the target block: tile the
        # trimmed H axis in sublane multiples (keeps double buffering alive
        # and stays under v7x's 64 MiB VMEM).
        c_blk = 1
        row_bytes = (_round_up(w_in_dim, 128) + _round_up(w_out, 128)) * itemsize
        h_blk = (target_block_bytes // max(1, row_bytes)) // sub * sub
        h_blk = int(max(sub, h_blk))
        tile_h = h_blk < h_out
    else:
        # Channels are small: copy many fused channels per step, but keep
        # >= 2 balanced blocks when possible so both v7x TensorCores (and
        # both DMA streams) share the 'parallel' copy.  The leading block dim
        # is not sublane/lane constrained, so no 8-alignment is forced.
        max_c = max(1, target_block_bytes // per_c_vmem)
        n_blocks = max(pl.cdiv(nc, max_c), 2 if nc >= 2 else 1)
        c_blk = pl.cdiv(nc, n_blocks)

    if tile_h:
        grid = (pl.cdiv(nc, c_blk), pl.cdiv(h_out, h_blk))
        in_spec = pl.BlockSpec((c_blk, h_blk, w_in_dim), lambda i, j: (i, j, 0))
        out_spec = pl.BlockSpec((c_blk, h_blk, w_out), lambda i, j: (i, j, 0))
        semantics = ("parallel", "parallel")
        in_block_bytes = c_blk * h_blk * _round_up(w_in_dim, 128) * itemsize
        out_block_bytes = c_blk * h_blk * _round_up(w_out, 128) * itemsize
    else:
        grid = (pl.cdiv(nc, c_blk),)
        in_spec = pl.BlockSpec((c_blk, h_in_dim, w_in_dim), lambda i: (i, 0, 0))
        out_spec = pl.BlockSpec((c_blk, h_out, w_out), lambda i: (i, 0, 0))
        semantics = ("parallel",)
        in_block_bytes = c_blk * in_c_vmem
        out_block_bytes = c_blk * out_c_vmem
    block_bytes = in_block_bytes + out_block_bytes

    # Double-buffered in + out, plus headroom; capped below the chip's real
    # VMEM (64 MiB on v7x, 128 MiB on v5e/v6e).
    vmem_limit = int(
        min(vmem_cap - (8 << 20), max(32 << 20, 2 * block_bytes + (4 << 20)))
    )
    vmem_limit = max(vmem_limit, 2 * block_bytes + (1 << 20))

    bytes_accessed = int(
        nc * h_in_dim * w_in_dim * itemsize + nc * h_out * w_out * itemsize
    )

    out3 = pl.pallas_call(
        _trim_kernel,
        out_shape=jax.ShapeDtypeStruct((nc, h_out, w_out), x.dtype),
        grid_spec=pltpu.PrefetchScalarGridSpec(
            num_scalar_prefetch=0,
            grid=grid,
            in_specs=[in_spec],
            out_specs=out_spec,
        ),
        compiler_params=pltpu.CompilerParams(
            dimension_semantics=semantics,
            vmem_limit_bytes=vmem_limit,
        ),
        cost_estimate=pl.CostEstimate(
            flops=0,
            transcendentals=0,
            bytes_accessed=bytes_accessed,
        ),
    )(x3)

    return out3.reshape(n, c, h_out, w_out)


# Below ~1 MiB the fixed pallas_call launch/pipeline cost dwarfs the copy;
# a fused XLA slice is strictly faster there on every TPU generation.
_PALLAS_MIN_BYTES = 1 << 20


def tensor_trimmer(x):
    """Public entry point: dispatches tiny inputs to a plain XLA slice."""
    if x.size * jnp.dtype(x.dtype).itemsize < _PALLAS_MIN_BYTES:
        return x[:, :, :-1, :-1]
    return tensor_trimmer_pallas(x)


if __name__ == "__main__":
    key = jax.random.PRNGKey(0)

    # Case 1: small NCHW input (spatial 17 -> trimmed to 16); call the Pallas
    # path directly so the kernel is exercised even at toy size.
    x = jax.random.normal(key, (2, 4, 17, 17), dtype=jnp.float32)
    y = jax.block_until_ready(tensor_trimmer_pallas(x))
    ref = x[:, :, :-1, :-1]
    assert y.shape == (2, 4, 16, 16), y.shape
    assert jnp.array_equal(y, ref), "mismatch vs reference slice (case 1)"

    # Case 2: more channels -> multi-block 'parallel' grid.
    x2 = jax.random.normal(jax.random.PRNGKey(1), (2, 64, 17, 17), jnp.float32)
    y2 = jax.block_until_ready(tensor_trimmer_pallas(x2))
    assert jnp.array_equal(y2, x2[:, :, :-1, :-1]), "mismatch (case 2)"

    # Case 3: odd spatial dims (in-kernel H and W trims) and a fused channel
    # count that splits into ragged balanced blocks.
    x3 = jax.random.normal(jax.random.PRNGKey(2), (1, 10, 13, 21), jnp.float32)
    y3 = jax.block_until_ready(tensor_trimmer_pallas(x3))
    assert jnp.array_equal(y3, x3[:, :, :-1, :-1]), "mismatch (case 3)"

    # Case 4: W_out == 128 and H_out == 32 -> both trims in the BlockSpec,
    # kernel is a pure dense copy; ragged leading-dim block (3 -> 2+1).
    x4 = jax.random.normal(jax.random.PRNGKey(3), (1, 3, 33, 129), jnp.float32)
    y4 = jax.block_until_ready(tensor_trimmer_pallas(x4))
    assert jnp.array_equal(y4, x4[:, :, :-1, :-1]), "mismatch (case 4)"

    # Case 5: bf16 (sublane tile = 16); H_out = 32 is 16-aligned so the H trim
    # still lands in the BlockSpec with dtype-aware alignment.
    x5 = jax.random.normal(jax.random.PRNGKey(4), (2, 4, 33, 17)).astype(jnp.bfloat16)
    y5 = jax.block_until_ready(tensor_trimmer_pallas(x5))
    assert jnp.array_equal(y5, x5[:, :, :-1, :-1]), "mismatch (case 5 bf16)"

    # Case 6: force the H-tiling path with a tiny target block size.
    x6 = jax.random.normal(jax.random.PRNGKey(5), (1, 2, 65, 33), jnp.float32)
    y6 = jax.block_until_ready(
        tensor_trimmer_pallas(x6, target_block_bytes=32 << 10)
    )
    assert jnp.array_equal(y6, x6[:, :, :-1, :-1]), "mismatch (case 6 H-tiled)"

    # Case 7: degenerate shape (H == 1 -> empty output) short-circuits.
    x7 = jax.random.normal(jax.random.PRNGKey(6), (1, 2, 1, 5), jnp.float32)
    y7 = jax.block_until_ready(tensor_trimmer_pallas(x7))
    assert y7.shape == (1, 2, 0, 4) and jnp.array_equal(y7, x7[:, :, :-1, :-1])

    # Dispatcher sanity check (tiny input -> plain XLA slice path).
    yd = jax.block_until_ready(tensor_trimmer(x))
    assert jnp.array_equal(yd, ref), "dispatcher mismatch"

    print("KERNEL_OK")
</pallas_src>

<mosaic_0001>
module attributes {stable_mosaic.version = 11 : i64} {
  func.func @_trim_kernel(%arg0: i32, %arg1: memref<4x16x17xf32, #tpu.memory_space<vmem>>, %arg2: memref<4x16x16xf32, #tpu.memory_space<vmem>>) attributes {dimension_semantics = [#tpu.dimension_semantics<parallel>], iteration_bounds = array<i64: 2>, scalar_prefetch = 0 : i64, scratch_operands = 0 : i64, tpu.core_type = #tpu.core_type<tc>, window_params = [{transform_indices = @transform_0, window_bounds = array<i64: 4, 16, 17>}, {transform_indices = @transform_1, window_bounds = array<i64: 4, 16, 16>}]} {
    %c0 = arith.constant 0 : index
    %c0_0 = arith.constant 0 : index
    %c0_1 = arith.constant 0 : index
    %0 = vector.load %arg1[%c0, %c0_0, %c0_1] : memref<4x16x17xf32, #tpu.memory_space<vmem>>, vector<4x16x16xf32>
    %c0_2 = arith.constant 0 : index
    %c0_3 = arith.constant 0 : index
    %c0_4 = arith.constant 0 : index
    %1 = vector.load %arg2[%c0_2, %c0_3, %c0_4] : memref<4x16x16xf32, #tpu.memory_space<vmem>>, vector<4x16x16xf32>
    tpu.vector_store %arg2[%c0_2, %c0_3, %c0_4], %0 {strides = array<i32>} : memref<4x16x16xf32, #tpu.memory_space<vmem>>, vector<4x16x16xf32>,
    return
  }
  func.func @transform_0(%arg0: i32) -> (i32, i32, i32) {
    %c0_i32 = arith.constant 0 : i32
    %c0_i32_0 = arith.constant 0 : i32
    %c0_i32_1 = arith.constant 0 : i32
    return %arg0, %c0_i32, %c0_i32_0 : i32, i32, i32
  }
  func.func @transform_1(%arg0: i32) -> (i32, i32, i32) {
    %c0_i32 = arith.constant 0 : i32
    %c0_i32_0 = arith.constant 0 : i32
    %c0_i32_1 = arith.constant 0 : i32
    return %arg0, %c0_i32, %c0_i32_0 : i32, i32, i32
  }
}

</mosaic_0001>

<bundles_post_ra>
// kernel: tpu_custom_call.1
= control target key start
LH: loop header
LB: loop body
LE: loop exit
PB: predicated region body
PF: predicated region fallthrough
CT: control target
= control target key end

     0   :  { %6 = vsyncpa [#allocation4], 0  ;;  %s532_s0 = inlined_call_operand.vmem [shape: f32[8,17,17], index: 0, kind: input, shape index: {}]   ;;  %s533_s1 = inlined_call_operand.hbm [shape: f32[8,16,16], index: 1, kind: output, shape index: {}]  }
   0x1   :  { %8 = vsyncpa [#allocation4 + $0x1], 0  ;;  %s417_s6 = smov 0   ;;  %s419_s7 = smov 0  }
   0x2   :  { %s421_s8 = smov 0   ;;  %s423_s9 = smov 0  }
   0x3 LB: > { %s281_s10 = sadd.s32 4294967295, %s402_s9   ;;  %s282_s11 = sadd.s32 4294967294, %s402_s9   ;;  %s402_s9 = sphi %s423_s9, %s539_s9   ;;  %s398_s8 = sphi %s421_s8, %s538_s8   ;;  %s394_s7 = sphi %s419_s7, %s537_s7   ;;  %s390_s6 = sphi %s417_s6, %s536_s6  }
   0x4   : > { %s440_s12 = sadd.s32 1, %s402_s9   ;;  %s21_s13 = sadd.s32 1, %s398_s8 }
   0x5   : > { %s18_s14 = ssub.s32 %s402_s9, %s440_s12  ;;  %p28_p0 = scmp.ne.s32.totalorder %s398_s8, %s394_s7 }
   0x6   : > { %p19_p1 = scmp.eq.s32.totalorder %s18_s14, 0  ;;  %p29_p2 = scmp.eq.s32.totalorder %s402_s9, 0 }
   0x7   : > { %p58_p3 = scmp.eq.s32.totalorder %s281_s10, 1  ;;  %p63_p4 = scmp.ne.s32.totalorder %s394_s7, %s390_s6 }
   0x8   : > { %s453_s15 = scalar_select %p19_p1, %s398_s8, %s21_s13  }
   0x9   : > { %p30_p5 = por %p29_p2, %p28_p0  ;;  %p455_p6 = por %p58_p3, %p28_p0 }
   0xa   : > { %p64_p7 = scmp.eq.s32.totalorder %s282_s11, 1  ;;  %p284_p9 = scmp.ge.s32.totalorder %s402_s9, 2 }
   0xc   : > { %p459_p8 = por %p64_p7, %p63_p4  ;;  %80 = sbr.rel (%p284_p9) target bundleno = 26 (0x1a), region = 16 }
  0x11   : > { %83 = sbr.rel (!%p30_p5) target bundleno = 26 (0x1a), region = 20  ;;  %s85_s18 = sand.u32 (%p30_p5), 1, %s398_s8  }
  0x12   : > { %s300_s19 = smul.u32 (%p30_p5), 96, %s402_s9  ;;  %s285_s20 = sshll.u32 (%p30_p5), %s85_s18, 6 }
  0x13   : > { %s87_s24 = scalar_lea.vmem (%p30_p5), [#allocation2], %s285_s20 }
  0x14   : > { %s91_s23 = scalar_lea.vmem (%p30_p5), %s532_s0, %s300_s19 }
  0x15   : > { %v134_v0 = vld [vmem:[%s91_s23] sm:$0xff] (%p30_p5)  ;;  %v136_v1 = vld [vmem:[%s91_s23 + $0x8] sm:$0xff] (%p30_p5)  ;;  %v138_v2 = vld [vmem:[%s91_s23 + $0x18] sm:$0xff] (%p30_p5) }
  0x16   : > { %135 = vst [vmem:[%s87_s24] sm:$0xff] %v134_v0  ;;  %137 = vst [vmem:[%s87_s24 + $0x8] sm:$0xff] %v136_v1  ;;  %v140_v3 = vld [vmem:[%s91_s23 + $0x20] sm:$0xff]  ;;  %v142_v4 = vld [vmem:[%s91_s23 + $0x30] sm:$0xff] }
  0x17   : > { %139 = vst [vmem:[%s87_s24 + $0x10] sm:$0xff] %v138_v2  ;;  %v144_v5 = vld [vmem:[%s91_s23 + $0x38] sm:$0xff]  ;;  %141 = vst [vmem:[%s87_s24 + $0x18] sm:$0xff] %v140_v3  ;;  %v146_v6 = vld [vmem:[%s91_s23 + $0x48] sm:$0xff] }
  0x18   : > { %143 = vst [vmem:[%s87_s24 + $0x20] sm:$0xff] %v142_v4  ;;  %145 = vst [vmem:[%s87_s24 + $0x28] sm:$0xff] %v144_v5  ;;  %v148_v7 = vld [vmem:[%s91_s23 + $0x50] sm:$0xff] }
  0x19   : > { %147 = vst [vmem:[%s87_s24 + $0x30] sm:$0xff] %v146_v6  ;;  %149 = vst [vmem:[%s87_s24 + $0x38] sm:$0xff] %v148_v7 }
  0x1a PF: > { %p289_p10 = scmp.ge.s32.totalorder %s402_s9, 1  ;;  %p154_p11 = scmp.lt.s32.totalorder %s402_s9, 3 }
  0x1c   : > { %p155_p12 = pnand %p289_p10, %p154_p11 }
  0x1d   : > { %s161_s25 = sand.u32 (!%p155_p12), 1, %s394_s7   ;;  %s299_s26 = sshll.u32 (!%p155_p12), %s281_s10, 10 }
  0x1e   : > { %158 = sbr.rel (%p155_p12) target bundleno = 56 (0x38), region = 58  ;;  %s290_s27 = sshll.u32 (!%p155_p12), %s161_s25, 6 }
  0x1f   : > { %s163_s28 = scalar_lea.vmem (!%p155_p12), [#allocation2], %s290_s27  ;;  %s179_s29 = scalar_lea.vmem (!%p155_p12), [#allocation3], %s290_s27 }
  0x20   : > { %s214_s30 = sshll.u32 (!%p155_p12), %s179_s29, 4  ;;  %s479_s4 = scalar_lea.hbm (!%p155_p12), %s533_s1, %s299_s26  ;;  %s482_s30 = int_to_ptr.vmem [resolvable:$true] %s214_s30 }
  0x21   : > { %s491_s5 = scalar_lea.sflag (!%p155_p12), [#allocation4], %s161_s25  ;;  %s342_s10 = scalar_lea.vmem (!%p155_p12), %s482_s30, 1024 }
  0x22   : > { %p343_p13 = scmp.ne.s32.totalorder (!%p155_p12), %s482_s30, %s342_s10  ;;  %s404_s11 = smov (!%p155_p12), [#allocation3]  }
  0x23   : > { %vm190_vm0 = vcmask 130048   ;;  %v182_v8 = vld [vmem:[%s163_s28] sm:$0xff]  ;;  %v183_v9 = vld [vmem:[%s163_s28 + $0x8] sm:$0xff]  ;;  %v184_v10 = vld [vmem:[%s163_s28 + $0x10] sm:$0xff]  ;;  %s346_s13 = sshll.u32 %s404_s11, 4  ;;  %s347_s13 = int_to_ptr.vmem [resolvable:$false] %s346_s13 }
  0x24   : > { %191 = vst.msk [vmem:[%s179_s29] sm:$0xff] %vm190_vm0, %v182_v8  ;;  %192 = vst.msk [vmem:[%s179_s29 + $0x8] sm:$0xff] %vm190_vm0, %v183_v9  ;;  %v185_v11 = vld [vmem:[%s163_s28 + $0x18] sm:$0xff]  ;;  %v186_v12 = vld [vmem:[%s163_s28 + $0x20] sm:$0xff]  ;;  %p344_p0 = pnand %p343_p13, %p455_p6  ;;  %s348_s14 = scalar_lea.vmem %s347_s13, 2048 }
  0x25   : > { %193 = vst.msk [vmem:[%s179_s29 + $0x10] sm:$0xff] %vm190_vm0, %v184_v10  ;;  %v187_v13 = vld [vmem:[%s163_s28 + $0x28] sm:$0xff]  ;;  %194 = vst.msk [vmem:[%s179_s29 + $0x18] sm:$0xff] %vm190_vm0, %v185_v11  ;;  %v188_v14 = vld [vmem:[%s163_s28 + $0x30] sm:$0xff]  ;;  %p349_p2 = scmp.lt.s32.totalorder %s482_s30, %s347_s13  ;;  %p350_p3 = scmp.lt.s32.totalorder %s348_s14, %s342_s10 }
  0x26   : > { %195 = vst.msk [vmem:[%s179_s29 + $0x20] sm:$0xff] %vm190_vm0, %v186_v12  ;;  %196 = vst.msk [vmem:[%s179_s29 + $0x28] sm:$0xff] %vm190_vm0, %v187_v13  ;;  %v189_v15 = vld [vmem:[%s163_s28 + $0x38] sm:$0xff]  ;;  %p345_p1 = pneg %p344_p0 }
  0x27   : > { %197 = vst.msk [vmem:[%s179_s29 + $0x30] sm:$0xff] %vm190_vm0, %v188_v14  ;;  %198 = vst.msk [vmem:[%s179_s29 + $0x38] sm:$0xff] %vm190_vm0, %v189_v15  ;;  %p351_p4 = por %p350_p3, %p349_p2 }
  0x29   : > { %p352_p5 = pnand %p351_p4, %p345_p1 }
  0x2b   : > { %355 = shalt.err (!%p352_p5)
}
  0x2c   : > { %s356_s18 = scalar_lea.hbm %s479_s4, 1024  ;;  %s360_s21 = scalar_lea.hbm %s533_s1, 2048 }
  0x2d   : > { %p357_p7 = scmp.ne.s32.totalorder %s479_s4, %s356_s18  ;;  %p361_p12 = scmp.lt.s32.totalorder %s479_s4, %s533_s1 }
  0x2e   : > { %p362_p13 = scmp.lt.s32.totalorder %s360_s21, %s356_s18 }
  0x2f   : > { %p358_p10 = pnand %p357_p7, %p455_p6 }
  0x30   : > { %p363_p0 = por %p362_p13, %p361_p12 }
  0x31   : > { %p359_p11 = pneg %p358_p10 }
  0x33   : > { %p364_p1 = pnand %p363_p0, %p359_p11 }
  0x35   : > { %367 = shalt.err (!%p364_p1)
}
  0x36   : > { %s405_s24 = smov 128   ;;  %s406_s25 = smov 8  }
  0x37   : > { %301 = dma.vmem_to_hbm [thread:$0]  (%p455_p6), %s482_s30, 1024, %s479_s4, %s491_s5, %s405_s24, %s405_s24, %s406_s25  }
  0x38 PF: > { %s229_s26 = sand.u32 1, %s390_s6   ;;  %p304_p2 = pnand %p284_p9, %p459_p8 }
  0x39   : > { %s230_s27 = scalar_lea.sflag [#allocation4], %s229_s26 }
  0x3a   : > { %p305_p3 = pneg %p304_p2 }
  0x3c   : > { %385 = dma.done.wait (%p305_p3), %s230_s27, 1024  }
  0x3d   : > { %387 = vsyncadd (%p305_p3), %s230_s27, 4294966272  ;;  %p11_p4 = scmp.ge.s32.totalorder %s440_s12, 4   ;;  %s536_s6 = smov %s394_s7 }
  0x3e   : > { %s537_s7 = smov %s398_s8  ;;  %s538_s8 = smov %s453_s15 }
  0x3f   : > { %s539_s9 = smov %s440_s12  ;;  %13 = sbr.rel (!%p11_p4) target bundleno = 3 (0x3), region = 102 }
  0x44   :  { %235 = vsyncpa [#allocation4], 1 }
  0x45   :  { %237 = vsyncpa [#allocation4 + $0x1], 1 }

</bundles_post_ra>
